<compile_context>
chip_gen: v5e
topology: v5e:2x2
jax: 0.10.0
libtpu: 0.0.40
codegen_flags: <defaults>
</compile_context>

<pallas_src>
import math

import jax
import jax.numpy as jnp
from jax import lax
from jax.experimental import pallas as pl
from jax.experimental.pallas import tpu as pltpu

LANE = 128


def _round_up(n, m):
    return ((n + m - 1) // m) * m


# ---------------------------------------------------------------------------
# Fused Pallas kernel: embedding gather + causal-mean + MLP block + lm head
# ---------------------------------------------------------------------------
def _bow_kernel(idx_ref, wte_ref, pos_ref, a_ref, wfc_ref, bfc_ref,
                wproj_ref, bproj_ref, wlm_ref, blm_ref, o_ref):
    mt = o_ref.shape[0]              # rows in this tile (= bt sequences * T tokens)
    vrows, cp = wte_ref.shape        # padded vocab rows (128), padded channels (128)
    seq_t = a_ref.shape[0]           # sequence length T
    bt = mt // seq_t                 # sequences in this tile

    # Token-embedding gather as a one-hot matmul on the MXU (wte stays resident in VMEM;
    # iota/compare run on the VPU slot, which has slack under the matmuls).
    idx = idx_ref[...]                                             # (mt, 1) int32
    lane_ids = lax.broadcasted_iota(jnp.int32, (mt, vrows), 1)     # (mt, Vp)
    onehot = (lane_ids == idx).astype(jnp.float32)                 # (mt, Vp)
    x = jnp.dot(onehot, wte_ref[...], preferred_element_type=jnp.float32)  # (mt, Cp)

    if seq_t % 8 == 0:
        # Per-sequence causal mean: reshape to (bt, T, Cp) -- free, T is sublane-aligned --
        # add the positional embedding by broadcast, then one small batched (T, T) matmul.
        x3 = x.reshape(bt, seq_t, cp) + pos_ref[...][None, :, :]   # (bt, T, Cp)
        a3 = jnp.broadcast_to(a_ref[...], (bt, seq_t, seq_t))      # (bt, T, T)
        y3 = jnp.einsum('bts,bsc->btc', a3, x3,
                        preferred_element_type=jnp.float32)
        x = (x3 + y3).reshape(mt, cp)                              # (mt, Cp)
    else:
        # TODO(synk): non-sublane-aligned T: fall back to an in-kernel generated
        # block-diagonal averaging matrix (no HBM traffic, but Mt/T extra MXU work).
        row = lax.broadcasted_iota(jnp.int32, (mt, mt), 0)
        col = lax.broadcasted_iota(jnp.int32, (mt, mt), 1)
        tpos = row % seq_t
        blockdiag = ((row // seq_t) == (col // seq_t)) & ((col % seq_t) <= tpos)
        w = jnp.where(blockdiag, 1.0 / (tpos + 1).astype(jnp.float32), 0.0)
        pr = lax.broadcasted_iota(jnp.int32, (mt, seq_t), 0) % seq_t
        pc = lax.broadcasted_iota(jnp.int32, (mt, seq_t), 1)
        pos_onehot = (pc == pr).astype(jnp.float32)                # (mt, T)
        x = x + jnp.dot(pos_onehot, pos_ref[...], preferred_element_type=jnp.float32)
        x = x + jnp.dot(w, x, preferred_element_type=jnp.float32)

    # MLP block with residual: x + c_proj(tanh(c_fc(x)))   (tanh -> EUP slot, free-ish)
    h = jnp.tanh(jnp.dot(x, wfc_ref[...], preferred_element_type=jnp.float32)
                 + bfc_ref[...])                                   # (mt, Hp)
    x = x + jnp.dot(h, wproj_ref[...], preferred_element_type=jnp.float32) + bproj_ref[...]

    # LM head -> lane-dense padded logits (mt, Vp)
    o_ref[...] = (jnp.dot(x, wlm_ref[...], preferred_element_type=jnp.float32)
                  + blm_ref[...]).astype(o_ref.dtype)


# ---------------------------------------------------------------------------
# One-time parameter padding + trace-time constants (hoisted out of the call path)
# ---------------------------------------------------------------------------
def prepare_bow_params(params, *, vocab_size, block_size, n_embd, n_embd2):
    wte, wpe, wfc, bfc, wproj, bproj, wlm, blm = params
    Vp = _round_up(vocab_size, LANE)
    Cp = _round_up(n_embd, LANE)
    Hp = _round_up(n_embd2, LANE)

    prepared = {
        "wte": jnp.zeros((Vp, Cp), jnp.float32).at[:vocab_size, :n_embd].set(wte),
        "wpe": jnp.zeros((block_size, Cp), jnp.float32).at[:, :n_embd].set(wpe),
        "wfc": jnp.zeros((Cp, Hp), jnp.float32).at[:n_embd, :n_embd2].set(wfc),
        "bfc": jnp.zeros((1, Hp), jnp.float32).at[0, :n_embd2].set(bfc),
        "wproj": jnp.zeros((Hp, Cp), jnp.float32).at[:n_embd2, :n_embd].set(wproj),
        "bproj": jnp.zeros((1, Cp), jnp.float32).at[0, :n_embd].set(bproj),
        "wlm": jnp.zeros((Cp, Vp), jnp.float32).at[:n_embd, :vocab_size].set(wlm),
        "blm": jnp.zeros((1, Vp), jnp.float32).at[0, :vocab_size].set(blm),
    }
    # Causal-mean matrix (softmax over masked zeros == uniform 1/(t+1) over s <= t).
    # The T<block_size case is just the top-left (T, T) slice of this matrix.
    tri = jnp.tril(jnp.ones((block_size, block_size), jnp.float32))
    prepared["amat"] = tri / tri.sum(axis=-1, keepdims=True)
    prepared["dims"] = (vocab_size, block_size, n_embd, n_embd2, Vp, Cp, Hp)
    return prepared


def _pick_batch_tile(B, T, max_rows=2048):
    """Sequences-per-tile bt: make the row tile large (amortize ~0.35 us/grid-step and
    keep output stores lane/sublane-dense), but keep >= 2 grid steps when B > 1 so the
    'parallel' grid axis can be sharded across v7x's two TensorCores. The tile must be
    sublane-aligned (bt*T % 8 == 0) unless it covers the whole array."""
    best = None
    for bt in range(1, B + 1):
        if B % bt:
            continue
        mt = bt * T
        if mt % 8 or mt > max_rows:
            continue
        if bt < B or B == 1:     # keep grid >= 2 when B > 1 (megacore on v7x)
            best = bt
    if best is not None:
        return best
    return B                     # single full-array tile: no alignment requirement


# ---------------------------------------------------------------------------
# Wrapper
# ---------------------------------------------------------------------------
def bow_forward(idx, prepared):
    vocab_size, block_size, n_embd, n_embd2, Vp, Cp, Hp = prepared["dims"]
    B, T = idx.shape
    assert T <= block_size, f"Cannot forward sequence of length {T}, block size {block_size}"

    bt = _pick_batch_tile(B, T)
    Mt = bt * T
    M = B * T
    grid = (B // bt,)

    a_t = prepared["amat"][:T, :T]      # (T, T)  causal-mean matrix
    pos_t = prepared["wpe"][:T]         # (T, Cp) positional embedding (tiled in-kernel)
    idx_col = idx.reshape(M, 1).astype(jnp.int32)

    logits_p = pl.pallas_call(
        _bow_kernel,
        out_shape=jax.ShapeDtypeStruct((M, Vp), jnp.float32),
        grid=grid,
        in_specs=[
            pl.BlockSpec((Mt, 1), lambda i: (i, 0)),    # idx rows for this tile
            pl.BlockSpec((Vp, Cp), lambda i: (0, 0)),   # wte          (weight-stationary)
            pl.BlockSpec((T, Cp), lambda i: (0, 0)),    # pos emb      (weight-stationary)
            pl.BlockSpec((T, T), lambda i: (0, 0)),     # causal-mean  (weight-stationary)
            pl.BlockSpec((Cp, Hp), lambda i: (0, 0)),   # c_fc.W
            pl.BlockSpec((1, Hp), lambda i: (0, 0)),    # c_fc.b
            pl.BlockSpec((Hp, Cp), lambda i: (0, 0)),   # c_proj.W
            pl.BlockSpec((1, Cp), lambda i: (0, 0)),    # c_proj.b
            pl.BlockSpec((Cp, Vp), lambda i: (0, 0)),   # lm_head.W
            pl.BlockSpec((1, Vp), lambda i: (0, 0)),    # lm_head.b
        ],
        out_specs=pl.BlockSpec((Mt, Vp), lambda i: (i, 0)),
        compiler_params=pltpu.CompilerParams(
            dimension_semantics=("parallel",)),
    )(idx_col, prepared["wte"], pos_t, a_t, prepared["wfc"], prepared["bfc"],
      prepared["wproj"], prepared["bproj"], prepared["wlm"], prepared["blm"])

    # Consumers that tolerate a 128-padded vocab axis can skip this slice (it writes a
    # second copy of the logits to HBM); the padded columns are exactly zero.
    logits = logits_p[:, :vocab_size].reshape(B, T, vocab_size)
    return logits, None          # targets=None path => loss is None


# ---------------------------------------------------------------------------
# Pure-JAX reference (replicates the PyTorch forward exactly)
# ---------------------------------------------------------------------------
def bow_reference(idx, params):
    wte, wpe, wfc, bfc, wproj, bproj, wlm, blm = params
    B, T = idx.shape
    x = wte[idx] + wpe[:T][None, :, :]                              # (B, T, C)
    mask = jnp.tril(jnp.ones((T, T), jnp.float32))[None]
    att = jnp.where(mask == 0, -jnp.inf, 0.0)
    att = jax.nn.softmax(att, axis=-1)                              # (1, T, T)
    y = jnp.einsum('bts,bsc->btc', jnp.broadcast_to(att, (B, T, T)), x)
    x = x + y
    h = jnp.tanh(x @ wfc + bfc)
    x = x + h @ wproj + bproj
    return x @ wlm + blm


# ---------------------------------------------------------------------------
# main
# ---------------------------------------------------------------------------
if __name__ == "__main__":
    # Small config consistent with the module
    vocab_size = 27
    block_size = 8           # T
    n_embd = 16
    n_embd2 = 64
    B = 2
    T = block_size

    key = jax.random.PRNGKey(0)
    ks = jax.random.split(key, 9)

    wte = 0.1 * jax.random.normal(ks[0], (vocab_size, n_embd), jnp.float32)
    wpe = 0.1 * jax.random.normal(ks[1], (block_size, n_embd), jnp.float32)
    wfc = jax.random.normal(ks[2], (n_embd, n_embd2), jnp.float32) / math.sqrt(n_embd)
    bfc = 0.01 * jax.random.normal(ks[3], (n_embd2,), jnp.float32)
    wproj = jax.random.normal(ks[4], (n_embd2, n_embd), jnp.float32) / math.sqrt(n_embd2)
    bproj = 0.01 * jax.random.normal(ks[5], (n_embd,), jnp.float32)
    wlm = jax.random.normal(ks[6], (n_embd, vocab_size), jnp.float32) / math.sqrt(n_embd)
    blm = 0.01 * jax.random.normal(ks[7], (vocab_size,), jnp.float32)
    params = (wte, wpe, wfc, bfc, wproj, bproj, wlm, blm)

    idx = jax.random.randint(ks[8], (B, T), 0, vocab_size, jnp.int32)

    # One-time preparation (padding + causal-mean matrix), hoisted out of the call path.
    prepared = prepare_bow_params(params, vocab_size=vocab_size, block_size=block_size,
                                  n_embd=n_embd, n_embd2=n_embd2)

    logits, loss = bow_forward(idx, prepared)
    logits = jax.block_until_ready(logits)

    ref = bow_reference(idx, params)
    assert logits.shape == (B, T, vocab_size)
    assert loss is None
    assert jnp.allclose(logits, ref, atol=1e-3, rtol=1e-3), \
        float(jnp.max(jnp.abs(logits - ref)))

    print("KERNEL_OK")
</pallas_src>

<mosaic_0001>
module attributes {stable_mosaic.version = 11 : i64} {
  func.func @_bow_kernel(%arg0: i32, %arg1: memref<8x1xi32, #tpu.memory_space<vmem>>, %arg2: memref<128x128xf32, #tpu.memory_space<vmem>>, %arg3: memref<8x128xf32, #tpu.memory_space<vmem>>, %arg4: memref<8x8xf32, #tpu.memory_space<vmem>>, %arg5: memref<128x128xf32, #tpu.memory_space<vmem>>, %arg6: memref<1x128xf32, #tpu.memory_space<vmem>>, %arg7: memref<128x128xf32, #tpu.memory_space<vmem>>, %arg8: memref<1x128xf32, #tpu.memory_space<vmem>>, %arg9: memref<128x128xf32, #tpu.memory_space<vmem>>, %arg10: memref<1x128xf32, #tpu.memory_space<vmem>>, %arg11: memref<8x128xf32, #tpu.memory_space<vmem>>) attributes {dimension_semantics = [#tpu.dimension_semantics<parallel>], iteration_bounds = array<i64: 2>, scalar_prefetch = 0 : i64, scratch_operands = 0 : i64, tpu.core_type = #tpu.core_type<tc>, window_params = [{transform_indices = @transform_0, window_bounds = array<i64: 8, 1>}, {pipeline_mode = #tpu.pipeline_mode<synchronous>, transform_indices = @transform_1, window_bounds = array<i64: 128, 128>}, {pipeline_mode = #tpu.pipeline_mode<synchronous>, transform_indices = @transform_2, window_bounds = array<i64: 8, 128>}, {pipeline_mode = #tpu.pipeline_mode<synchronous>, transform_indices = @transform_3, window_bounds = array<i64: 8, 8>}, {pipeline_mode = #tpu.pipeline_mode<synchronous>, transform_indices = @transform_4, window_bounds = array<i64: 128, 128>}, {pipeline_mode = #tpu.pipeline_mode<synchronous>, transform_indices = @transform_5, window_bounds = array<i64: 1, 128>}, {pipeline_mode = #tpu.pipeline_mode<synchronous>, transform_indices = @transform_6, window_bounds = array<i64: 128, 128>}, {pipeline_mode = #tpu.pipeline_mode<synchronous>, transform_indices = @transform_7, window_bounds = array<i64: 1, 128>}, {pipeline_mode = #tpu.pipeline_mode<synchronous>, transform_indices = @transform_8, window_bounds = array<i64: 128, 128>}, {pipeline_mode = #tpu.pipeline_mode<synchronous>, transform_indices = @transform_9, window_bounds = array<i64: 1, 128>}, {transform_indices = @transform_10, window_bounds = array<i64: 8, 128>}]} {
    %c0 = arith.constant 0 : index
    %c0_0 = arith.constant 0 : index
    %0 = vector.load %arg1[%c0, %c0_0] : memref<8x1xi32, #tpu.memory_space<vmem>>, vector<8x1xi32>
    %1 = tpu.iota {dimensions = array<i32: 1>} : vector<8x128xi32>
    %2 = vector.broadcast %0 : vector<8x1xi32> to vector<8x128xi32>
    %3 = arith.cmpi eq, %1, %2 : vector<8x128xi32>
    %4 = arith.extui %3 : vector<8x128xi1> to vector<8x128xi32>
    %5 = arith.sitofp %4 : vector<8x128xi32> to vector<8x128xf32>
    %c0_1 = arith.constant 0 : index
    %c0_2 = arith.constant 0 : index
    %6 = vector.load %arg2[%c0_1, %c0_2] : memref<128x128xf32, #tpu.memory_space<vmem>>, vector<128x128xf32>
    %cst = arith.constant dense<0.000000e+00> : vector<8x128xf32>
    %7 = tpu.matmul %5, %6, %cst {dimension_numbers = #tpu.dot_dimension_numbers<[1], [0], [0], [1], [0, 0, 1, 1], [], []>} : vector<8x128xf32>, vector<128x128xf32>, vector<8x128xf32> -> vector<8x128xf32>
    %8 = vector.shape_cast %7 : vector<8x128xf32> to vector<1x8x128xf32>
    %c0_3 = arith.constant 0 : index
    %c0_4 = arith.constant 0 : index
    %9 = vector.load %arg3[%c0_3, %c0_4] : memref<8x128xf32, #tpu.memory_space<vmem>>, vector<8x128xf32>
    %10 = vector.shape_cast %9 : vector<8x128xf32> to vector<1x8x128xf32>
    %11 = arith.addf %8, %10 : vector<1x8x128xf32>
    %c0_5 = arith.constant 0 : index
    %c0_6 = arith.constant 0 : index
    %12 = vector.load %arg4[%c0_5, %c0_6] : memref<8x8xf32, #tpu.memory_space<vmem>>, vector<8x8xf32>
    %13 = vector.shape_cast %12 : vector<8x8xf32> to vector<1x8x8xf32>
    "tpu.trace_start"() <{level = 10 : i32, message = "bts,bsc->btc"}> : () -> ()
    %cst_7 = arith.constant dense<0.000000e+00> : vector<1x8x128xf32>
    %14 = tpu.matmul %13, %11, %cst_7 {dimension_numbers = #tpu.dot_dimension_numbers<[2], [1], [1], [2], [0, 0, 0, 1, 1, 2], [0], [0]>} : vector<1x8x8xf32>, vector<1x8x128xf32>, vector<1x8x128xf32> -> vector<1x8x128xf32>
    "tpu.trace_stop"() : () -> ()
    %15 = arith.addf %11, %14 : vector<1x8x128xf32>
    %16 = vector.shape_cast %15 : vector<1x8x128xf32> to vector<8x128xf32>
    %c0_8 = arith.constant 0 : index
    %c0_9 = arith.constant 0 : index
    %17 = vector.load %arg5[%c0_8, %c0_9] : memref<128x128xf32, #tpu.memory_space<vmem>>, vector<128x128xf32>
    %cst_10 = arith.constant dense<0.000000e+00> : vector<8x128xf32>
    %18 = tpu.matmul %16, %17, %cst_10 {dimension_numbers = #tpu.dot_dimension_numbers<[1], [0], [0], [1], [0, 0, 1, 1], [], []>} : vector<8x128xf32>, vector<128x128xf32>, vector<8x128xf32> -> vector<8x128xf32>
    %c0_11 = arith.constant 0 : index
    %c0_12 = arith.constant 0 : index
    %19 = vector.load %arg6[%c0_11, %c0_12] : memref<1x128xf32, #tpu.memory_space<vmem>>, vector<1x128xf32>
    %20 = vector.broadcast %19 : vector<1x128xf32> to vector<8x128xf32>
    %21 = arith.addf %18, %20 : vector<8x128xf32>
    %22 = math.tanh %21 : vector<8x128xf32>
    %c0_13 = arith.constant 0 : index
    %c0_14 = arith.constant 0 : index
    %23 = vector.load %arg7[%c0_13, %c0_14] : memref<128x128xf32, #tpu.memory_space<vmem>>, vector<128x128xf32>
    %cst_15 = arith.constant dense<0.000000e+00> : vector<8x128xf32>
    %24 = tpu.matmul %22, %23, %cst_15 {dimension_numbers = #tpu.dot_dimension_numbers<[1], [0], [0], [1], [0, 0, 1, 1], [], []>} : vector<8x128xf32>, vector<128x128xf32>, vector<8x128xf32> -> vector<8x128xf32>
    %25 = arith.addf %16, %24 : vector<8x128xf32>
    %c0_16 = arith.constant 0 : index
    %c0_17 = arith.constant 0 : index
    %26 = vector.load %arg8[%c0_16, %c0_17] : memref<1x128xf32, #tpu.memory_space<vmem>>, vector<1x128xf32>
    %27 = vector.broadcast %26 : vector<1x128xf32> to vector<8x128xf32>
    %28 = arith.addf %25, %27 : vector<8x128xf32>
    %c0_18 = arith.constant 0 : index
    %c0_19 = arith.constant 0 : index
    %29 = vector.load %arg9[%c0_18, %c0_19] : memref<128x128xf32, #tpu.memory_space<vmem>>, vector<128x128xf32>
    %cst_20 = arith.constant dense<0.000000e+00> : vector<8x128xf32>
    %30 = tpu.matmul %28, %29, %cst_20 {dimension_numbers = #tpu.dot_dimension_numbers<[1], [0], [0], [1], [0, 0, 1, 1], [], []>} : vector<8x128xf32>, vector<128x128xf32>, vector<8x128xf32> -> vector<8x128xf32>
    %c0_21 = arith.constant 0 : index
    %c0_22 = arith.constant 0 : index
    %31 = vector.load %arg10[%c0_21, %c0_22] : memref<1x128xf32, #tpu.memory_space<vmem>>, vector<1x128xf32>
    %32 = vector.broadcast %31 : vector<1x128xf32> to vector<8x128xf32>
    %33 = arith.addf %30, %32 : vector<8x128xf32>
    %c0_23 = arith.constant 0 : index
    %c0_24 = arith.constant 0 : index
    %34 = vector.load %arg11[%c0_23, %c0_24] : memref<8x128xf32, #tpu.memory_space<vmem>>, vector<8x128xf32>
    tpu.vector_store %arg11[%c0_23, %c0_24], %33 {strides = array<i32>} : memref<8x128xf32, #tpu.memory_space<vmem>>, vector<8x128xf32>,
    return
  }
  func.func @transform_0(%arg0: i32) -> (i32, i32) {
    %c0_i32 = arith.constant 0 : i32
    %c0_i32_0 = arith.constant 0 : i32
    return %arg0, %c0_i32 : i32, i32
  }
  func.func @transform_1(%arg0: i32) -> (i32, i32) {
    %c0_i32 = arith.constant 0 : i32
    %c0_i32_0 = arith.constant 0 : i32
    %c0_i32_1 = arith.constant 0 : i32
    return %c0_i32, %c0_i32_0 : i32, i32
  }
  func.func @transform_2(%arg0: i32) -> (i32, i32) {
    %c0_i32 = arith.constant 0 : i32
    %c0_i32_0 = arith.constant 0 : i32
    %c0_i32_1 = arith.constant 0 : i32
    return %c0_i32, %c0_i32_0 : i32, i32
  }
  func.func @transform_3(%arg0: i32) -> (i32, i32) {
    %c0_i32 = arith.constant 0 : i32
    %c0_i32_0 = arith.constant 0 : i32
    %c0_i32_1 = arith.constant 0 : i32
    return %c0_i32, %c0_i32_0 : i32, i32
  }
  func.func @transform_4(%arg0: i32) -> (i32, i32) {
    %c0_i32 = arith.constant 0 : i32
    %c0_i32_0 = arith.constant 0 : i32
    %c0_i32_1 = arith.constant 0 : i32
    return %c0_i32, %c0_i32_0 : i32, i32
  }
  func.func @transform_5(%arg0: i32) -> (i32, i32) {
    %c0_i32 = arith.constant 0 : i32
    %c0_i32_0 = arith.constant 0 : i32
    %c0_i32_1 = arith.constant 0 : i32
    return %c0_i32, %c0_i32_0 : i32, i32
  }
  func.func @transform_6(%arg0: i32) -> (i32, i32) {
    %c0_i32 = arith.constant 0 : i32
    %c0_i32_0 = arith.constant 0 : i32
    %c0_i32_1 = arith.constant 0 : i32
    return %c0_i32, %c0_i32_0 : i32, i32
  }
  func.func @transform_7(%arg0: i32) -> (i32, i32) {
    %c0_i32 = arith.constant 0 : i32
    %c0_i32_0 = arith.constant 0 : i32
    %c0_i32_1 = arith.constant 0 : i32
    return %c0_i32, %c0_i32_0 : i32, i32
  }
  func.func @transform_8(%arg0: i32) -> (i32, i32) {
    %c0_i32 = arith.constant 0 : i32
    %c0_i32_0 = arith.constant 0 : i32
    %c0_i32_1 = arith.constant 0 : i32
    return %c0_i32, %c0_i32_0 : i32, i32
  }
  func.func @transform_9(%arg0: i32) -> (i32, i32) {
    %c0_i32 = arith.constant 0 : i32
    %c0_i32_0 = arith.constant 0 : i32
    %c0_i32_1 = arith.constant 0 : i32
    return %c0_i32, %c0_i32_0 : i32, i32
  }
  func.func @transform_10(%arg0: i32) -> (i32, i32) {
    %c0_i32 = arith.constant 0 : i32
    %c0_i32_0 = arith.constant 0 : i32
    return %arg0, %c0_i32 : i32, i32
  }
}

</mosaic_0001>

<bundles_post_ra>
// kernel: tpu_custom_call.1
= control target key start
LH: loop header
LB: loop body
LE: loop exit
PB: predicated region body
PF: predicated region fallthrough
CT: control target
= control target key end

     0   :  { %s1252_s0 = inlined_call_operand.vmem [shape: s32[16,1], index: 0, kind: input, shape index: {}]   ;;  %s1253_s1 = inlined_call_operand.hbm [shape: f32[128,128], index: 1, kind: input, shape index: {}]   ;;  %s1254_s2 = inlined_call_operand.vmem [shape: f32[8,128], index: 2, kind: input, shape index: {}]   ;;  %s1255_s3 = inlined_call_operand.vmem [shape: f32[8,8], index: 3, kind: input, shape index: {}]   ;;  %s1256_s4 = inlined_call_operand.hbm [shape: f32[128,128], index: 4, kind: input, shape index: {}]   ;;  %s1257_s5 = inlined_call_operand.vmem [shape: f32[1,128], index: 5, kind: input, shape index: {}]   ;;  %s1258_s6 = inlined_call_operand.hbm [shape: f32[128,128], index: 6, kind: input, shape index: {}]   ;;  %s1259_s7 = inlined_call_operand.vmem [shape: f32[1,128], index: 7, kind: input, shape index: {}]   ;;  %s1260_s8 = inlined_call_operand.hbm [shape: f32[128,128], index: 8, kind: input, shape index: {}]   ;;  %s1261_s9 = inlined_call_operand.vmem [shape: f32[1,128], index: 9, kind: input, shape index: {}]   ;;  %s1262_s10 = inlined_call_operand.hbm [shape: f32[16,128], index: 10, kind: output, shape index: {}]  }
   0x1   :  { %1267 = sst [smem:[#allocation19_spill]] %s1253_s1 }
   0x2   :  { %1268 = sst [smem:[#allocation20_spill]] %s1256_s4 }
   0x3   :  { %15 = vsyncpa [#allocation3], 0 }
   0x4   :  { %16 = vsyncpa [#allocation6], 0 }
   0x5   :  { %17 = vsyncpa [#allocation9], 0 }
   0x6   :  { %18 = vsyncpa [#allocation4], 0 }
   0x7   :  { %20 = vsyncpa [#allocation4 + $0x1], 0  ;;  %s1105_s13 = smov 0   ;;  %s1107_s14 = smov 0  }
   0x8   :  { %s1109_s15 = smov 0   ;;  %s1111_s16 = smov 0  }
   0x9 LB: > { %1269 = sst [smem:[#allocation15_spill]] %s1036_s15  ;;  %s1126_s17 = sadd.s32 4294967295, %s1040_s16   ;;  %s1040_s16 = sphi %s1111_s16, %s1280_s16   ;;  %s1036_s15 = sphi %s1109_s15, %s1282_s15   ;;  %s1032_s14 = sphi %s1107_s14, %s1284_s14   ;;  %s1028_s13 = sphi %s1105_s13, %s1283_s13  }
   0xa   : > { %s735_s18 = sadd.s32 4294967294, %s1040_s16   ;;  %s1130_s19 = sadd.s32 1, %s1040_s16  }
   0xb   : > { %1270 = sst [smem:[#allocation16_spill]] %s1130_s19  ;;  %s248_s20 = sadd.s32 1, %s1036_s15 }
   0xc   : > { %s245_s21 = ssub.s32 %s1040_s16, %s1130_s19  ;;  %p258_p0 = scmp.ne.s32.totalorder %s1036_s15, %s1032_s14 }
   0xd   : > { %p246_p1 = scmp.eq.s32.totalorder %s245_s21, 0  ;;  %p259_p2 = scmp.eq.s32.totalorder %s1126_s17, 1 }
   0xe   : > { %p264_p3 = scmp.ne.s32.totalorder %s1032_s14, %s1028_s13  ;;  %p265_p4 = scmp.eq.s32.totalorder %s735_s18, 1 }
   0xf   : > { %s1141_s22 = scalar_select %p246_p1, %s1036_s15, %s248_s20  }
  0x10   : > { %p1143_p5 = por %p259_p2, %p258_p0  ;;  %p1147_p6 = por %p265_p4, %p264_p3 }
  0x11   : > { %1271 = sst [smem:[#allocation17_spill]] %s1141_s22  ;;  %p736_p7 = scmp.ge.s32.totalorder %s1040_s16, 1 }
  0x12   : > { %s1273_s24 = scalar_select %p1147_p6, 1, 0 }
  0x13   : > { %p272_p8 = scmp.lt.s32.totalorder %s1040_s16, 3  ;;  %p791_p9 = scmp.eq.s32.totalorder %s1126_s17, 0 }
  0x14   : > { %1274 = sst [smem:[#allocation18_spill]] %s1273_s24  ;;  %s1042_s18 = smov [#allocation5]  }
  0x15   : > { %p1154_p10 = pnand %p736_p7, %p272_p8  ;;  %s1276_s4 = sld [smem:[#allocation20_spill]] }
  0x16   : > { %s1277_s1 = sld [smem:[#allocation19_spill]]  ;;  %s305_s20 = sshll.u32 %s1042_s18, 4  ;;  %s306_s20 = int_to_ptr.vmem [resolvable:$true] %s305_s20 }
  0x17   : > { %p774_p11 = pneg %p1154_p10  ;;  %s1043_s21 = smov 128  }
  0x18   : > { %s1044_s26 = smov 8   ;;  %s1045_s27 = smov [#allocation2]  }
  0x19   : > { %p1168_p12 = pnand %p791_p9, %p774_p11  ;;  %s285_s29 = sshll.u32 %s1045_s27, 4  ;;  %s286_s29 = int_to_ptr.vmem [resolvable:$true] %s285_s29 }
  0x1a   : > { %s337_s15 = sshll.u32 %s1260_s8, 4  ;;  %s1046_s19 = smov [#allocation7]   ;;  %s338_s15 = int_to_ptr.hbm [resolvable:$true] %s337_s15 }
  0x1b   : > { %s303_s28 = sshll.u32 %s1276_s4, 4  ;;  %s320_s4 = sshll.u32 %s1258_s6, 4  ;;  %s304_s28 = int_to_ptr.hbm [resolvable:$true] %s303_s28  ;;  %s321_s4 = int_to_ptr.hbm [resolvable:$true] %s320_s4 }
  0x1c   : > { %s283_s11 = sshll.u32 %s1277_s1, 4  ;;  %s322_s24 = sshll.u32 %s1046_s19, 4  ;;  %s284_s11 = int_to_ptr.hbm [resolvable:$true] %s283_s11  ;;  %s323_s24 = int_to_ptr.vmem [resolvable:$true] %s322_s24 }
  0x1d   : > { %780 = dma.hbm_to_vmem [thread:$0]  (!%p1168_p12), %s304_s28, 2048, %s306_s20, [#allocation6], %s1043_s21, %s1043_s21, %s1044_s26  }
  0x1e   : > { %777 = dma.hbm_to_vmem [thread:$0]  (!%p1168_p12), %s284_s11, 2048, %s286_s29, [#allocation3], %s1043_s21, %s1043_s21, %s1044_s26  }
  0x1f   : > { %783 = dma.hbm_to_vmem [thread:$0]  (!%p1168_p12), %s321_s4, 2048, %s323_s24, [#allocation6], %s1043_s21, %s1043_s21, %s1044_s26  }
  0x20   : > { %s1047_s28 = smov [#allocation8]   ;;  %365 = sbr.rel (%p1154_p10) target bundleno = 830 (0x33e), region = 60 }
  0x21   : > { %s339_s20 = sshll.u32 %s1047_s28, 4  ;;  %s340_s20 = int_to_ptr.vmem [resolvable:$true] %s339_s20 }
  0x22   : > { %786 = dma.hbm_to_vmem [thread:$0]  (!%p1168_p12), %s338_s15, 2048, %s340_s20, [#allocation9], %s1043_s21, %s1043_s21, %s1044_s26  }
  0x25   : > { %1011 = dma.done.wait (%p791_p9), [#allocation3], 2048  }
  0x26   : > { %1013 = vsyncadd (%p791_p9), [#allocation3], 4294965248 }
  0x27   : > { %1015 = dma.done.wait (%p791_p9), [#allocation6], 4096  }
  0x28   : > { %1017 = vsyncadd (%p791_p9), [#allocation6], 4294963200 }
  0x29   : > { %1019 = dma.done.wait (%p791_p9), [#allocation9], 2048  }
  0x2a   : > { %1021 = vsyncadd (%p791_p9), [#allocation9], 4294965248  ;;  %p418_p13 = scmp.lt.s32.totalorder %s1126_s17, 1  ;;  %v1048_v0 = vmov 0   ;;  %v446_v2 = vld [vmem:[#allocation2 + $0x78] sm:$0xff]  ;;  %v445_v3 = vld [vmem:[#allocation2 + $0x70] sm:$0xff]  ;;  %v423_v18 = vlaneseq }
  0x2b   : > { %840 = vset.pattern.permute.xlu0 %v1048_v0  ;;  %447 = vmatpush.msra.mxu0 %v446_v2  ;;  %v444_v4 = vld [vmem:[#allocation2 + $0x68] sm:$0xff]  ;;  %v443_v5 = vld [vmem:[#allocation2 + $0x60] sm:$0xff]  ;;  %v442_v6 = vld [vmem:[#allocation2 + $0x58] sm:$0xff]  ;;  %v1049_v21 = vmov 1.0   ;;  %vm470_vm1 = vcmask 64512   ;;  %s415_s30 = sand.u32 1, %s1032_s14  }
  0x2c   : > { %s419_s1 = scalar_select %p418_p13, %s1126_s17, 1  ;;  %v441_v7 = vld [vmem:[#allocation2 + $0x50] sm:$0xff]  ;;  %v440_v8 = vld [vmem:[#allocation2 + $0x48] sm:$0xff]  ;;  %v439_v9 = vld [vmem:[#allocation2 + $0x40] sm:$0xff]  ;;  %v424_v19 = vand.u32 127, %v423_v18 }
  0x2d   : > { %448 = vmatpush.msra.mxu0 %v445_v3  ;;  %v438_v10 = vld [vmem:[#allocation2 + $0x38] sm:$0xff]  ;;  %v437_v11 = vld [vmem:[#allocation2 + $0x30] sm:$0xff]  ;;  %v436_v12 = vld [vmem:[#allocation2 + $0x28] sm:$0xff]  ;;  %s747_s18 = sshll.u32 %s415_s30, 3  ;;  %s753_s28 = sshll.u32 %s1126_s17, 3 }
  0x2e   : > { %s748_s4 = sshll.u32 %s419_s1, 3  ;;  %v435_v13 = vld [vmem:[#allocation2 + $0x20] sm:$0xff]  ;;  %v434_v14 = vld [vmem:[#allocation2 + $0x18] sm:$0xff]  ;;  %v433_v15 = vld [vmem:[#allocation2 + $0x10] sm:$0xff]  ;;  %s620_s11 = scalar_lea.sflag [#allocation4], %s415_s30 }
  0x2f   : > { %s421_s22 = scalar_lea.vmem %s1252_s0, %s748_s4  ;;  %449 = vmatpush.msra.mxu0 %v444_v4  ;;  %v432_v16 = vld [vmem:[#allocation2 + $0x8] sm:$0xff]  ;;  %v431_v17 = vld [vmem:[#allocation2] sm:$0xff]  ;;  %v510_v22 = vld [vmem:[#allocation5 + $0x78] sm:$0xff]  ;;  %s630_s4 = scalar_lea.hbm %s1262_s10, %s753_s28 }
  0x30   : > { %v422_v1 = vld [vmem:[%s421_s22] sm:$0xff]  ;;  %v509_v23 = vld [vmem:[#allocation5 + $0x70] sm:$0xff]  ;;  %515 = vmatpush.msra.mxu2 %v510_v22  ;;  %v508_v24 = vld [vmem:[#allocation5 + $0x68] sm:$0xff]  ;;  %s417_s22 = scalar_lea.vmem [#allocation10], %s747_s18  ;;  %s634_s25 = sshll.u32 %s630_s4, 4  ;;  %s635_s25 = int_to_ptr.hbm [resolvable:$true] %s634_s25 }
  0x31   : > { %426 = vperm.xlu0 %840, %v422_v1   ;;  %450 = vmatpush.msra.mxu0 %v443_v5  ;;  %v507_v25 = vld [vmem:[#allocation5 + $0x60] sm:$0xff]  ;;  %v506_v26 = vld [vmem:[#allocation5 + $0x58] sm:$0xff]  ;;  %v505_v27 = vld [vmem:[#allocation5 + $0x50] sm:$0xff]  ;;  %s632_s24 = sshll.u32 %s417_s22, 4  ;;  %s980_s12 = sshra.s32 %s635_s25, 4  ;;  %s633_s24 = int_to_ptr.vmem [resolvable:$true] %s632_s24  ;;  %s981_s12 = int_to_ptr.hbm [resolvable:$true] %s980_s12 }
  0x32   : > { %516 = vmatpush.msra.mxu2 %v509_v23  ;;  %v504_v28 = vld [vmem:[#allocation5 + $0x48] sm:$0xff]  ;;  %v503_v29 = vld [vmem:[#allocation5 + $0x40] sm:$0xff]  ;;  %v502_v30 = vld [vmem:[#allocation5 + $0x38] sm:$0xff]  ;;  %s982_s17 = scalar_lea.hbm %s981_s12, 8  ;;  %s986_s27 = scalar_lea.hbm %s1262_s10, 16 }
  0x33   : > { %451 = vmatpush.msra.mxu0 %v442_v6  ;;  %v501_v31 = vld [vmem:[#allocation5 + $0x30] sm:$0xff]  ;;  %v500_v32 = vld [vmem:[#allocation5 + $0x28] sm:$0xff]  ;;  %v499_v33 = vld [vmem:[#allocation5 + $0x20] sm:$0xff]  ;;  %p983_p0 = scmp.ne.s32.totalorder %s981_s12, %s982_s17  ;;  %p987_p3 = scmp.lt.s32.totalorder %s981_s12, %s1262_s10 }
  0x34   : > { %517 = vmatpush.msra.mxu2 %v508_v24  ;;  %v498_v34 = vld [vmem:[#allocation5 + $0x18] sm:$0xff]  ;;  %v497_v35 = vld [vmem:[#allocation5 + $0x10] sm:$0xff]  ;;  %v467_v36 = vld [vmem:[%s1254_s2] sm:$0xff]  ;;  %p988_p4 = scmp.lt.s32.totalorder %s986_s27, %s982_s17 }
  0x35   : > { %452 = vmatpush.msra.mxu0 %v441_v7  ;;  %v469_v39 = vld [vmem:[%s1255_s3] sm:$0xff]  ;;  %v496_v40 = vld [vmem:[#allocation5 + $0x8] sm:$0xff]  ;;  %v551_v42 = vld [vmem:[#allocation7 + $0x78] sm:$0xff]  ;;  %p984_p1 = pnand %p983_p0, %p1143_p5 }
  0x36   : > { %518 = vmatpush.msra.mxu2 %v507_v25  ;;  %v495_v41 = vld [vmem:[#allocation5] sm:$0xff]  ;;  %v550_v43 = vld [vmem:[#allocation7 + $0x70] sm:$0xff]  ;;  %552 = vmatpush.msra.mxu3 %v551_v42  ;;  %v549_v44 = vld [vmem:[#allocation7 + $0x68] sm:$0xff]  ;;  %p989_p7 = por %p988_p4, %p987_p3 }
  0x37   : > { %453 = vmatpush.msra.mxu0 %v440_v8  ;;  %v548_v45 = vld [vmem:[#allocation7 + $0x60] sm:$0xff]  ;;  %v547_v46 = vld [vmem:[#allocation7 + $0x58] sm:$0xff]  ;;  %v546_v47 = vld [vmem:[#allocation7 + $0x50] sm:$0xff]  ;;  %p985_p2 = pneg %p984_p1 }
  0x38   : > { %519 = vmatpush.msra.mxu2 %v506_v26  ;;  %553 = vmatpush.msra.mxu3 %v550_v43  ;;  %v545_v48 = vld [vmem:[#allocation7 + $0x48] sm:$0xff]  ;;  %v544_v49 = vld [vmem:[#allocation7 + $0x40] sm:$0xff]  ;;  %v543_v50 = vld [vmem:[#allocation7 + $0x38] sm:$0xff] }
  0x39   : > { %454 = vmatpush.msra.mxu0 %v439_v9  ;;  %v542_v51 = vld [vmem:[#allocation7 + $0x30] sm:$0xff]  ;;  %v541_v52 = vld [vmem:[#allocation7 + $0x28] sm:$0xff]  ;;  %v540_v55 = vld [vmem:[#allocation7 + $0x20] sm:$0xff]  ;;  %p990_p8 = pnand %p989_p7, %p985_p2 }
  0x3a   : > { %520 = vmatpush.msra.mxu2 %v505_v27  ;;  %554 = vmatpush.msra.mxu3 %v549_v44  ;;  %v539_v56 = vld [vmem:[#allocation7 + $0x18] sm:$0xff]  ;;  %v538_v57 = vld [vmem:[#allocation7 + $0x10] sm:$0xff]  ;;  %v537_v58 = vld [vmem:[#allocation7 + $0x8] sm:$0xff] }
  0x3b   : > { %455 = vmatpush.msra.mxu0 %v438_v10  ;;  %v536_v59 = vld [vmem:[#allocation7] sm:$0xff]  ;;  %v593_v60 = vld [vmem:[#allocation8 + $0x78] sm:$0xff]  ;;  %v592_v61 = vld [vmem:[#allocation8 + $0x70] sm:$0xff] }
  0x3c   : > { %521 = vmatpush.msra.mxu2 %v504_v28  ;;  %555 = vmatpush.msra.mxu3 %v548_v45  ;;  %v591_v62 = vld [vmem:[#allocation8 + $0x68] sm:$0xff]  ;;  %v590_v63 = vld [vmem:[#allocation8 + $0x60] sm:$0xff]  ;;  %v589_v0 = vld [vmem:[#allocation8 + $0x58] sm:$0xff] }
  0x3d   : > { %456 = vmatpush.msra.mxu0 %v437_v11  ;;  %v588_v1 = vld [vmem:[#allocation8 + $0x50] sm:$0xff]  ;;  %v587_v2 = vld [vmem:[#allocation8 + $0x48] sm:$0xff]  ;;  %v586_v3 = vld [vmem:[#allocation8 + $0x40] sm:$0xff] }
  0x3e   : > { %522 = vmatpush.msra.mxu2 %v503_v29  ;;  %556 = vmatpush.msra.mxu3 %v547_v46  ;;  %v585_v4 = vld [vmem:[#allocation8 + $0x38] sm:$0xff]  ;;  %v584_v5 = vld [vmem:[#allocation8 + $0x30] sm:$0xff]  ;;  %v583_v6 = vld [vmem:[#allocation8 + $0x28] sm:$0xff] }
  0x3f   : > { %457 = vmatpush.msra.mxu0 %v436_v12  ;;  %v841_v7 = vld [vmem:[%s1257_s5] ss:$0 sm:$0xff]  ;;  %v581_v10 = vld [vmem:[#allocation8 + $0x18] sm:$0xff] }
  0x40   : > { %523 = vmatpush.msra.mxu2 %v502_v30  ;;  %557 = vmatpush.msra.mxu3 %v546_v47  ;;  %v582_v8 = vld [vmem:[#allocation8 + $0x20] sm:$0xff] }
  0x41   : > { %458 = vmatpush.msra.mxu0 %v435_v13  ;;  %v580_v13 = vld [vmem:[#allocation8 + $0x10] sm:$0xff] }
  0x42   : > { %524 = vmatpush.msra.mxu2 %v501_v31  ;;  %558 = vmatpush.msra.mxu3 %v545_v48 }
  0x43   : > { %459 = vmatpush.msra.mxu0 %v434_v14  ;;  %v579_v14 = vld [vmem:[#allocation8 + $0x8] sm:$0xff] }
  0x44   : > { %525 = vmatpush.msra.mxu2 %v500_v32  ;;  %559 = vmatpush.msra.mxu3 %v544_v49 }
  0x45   : > { %460 = vmatpush.msra.mxu0 %v433_v15  ;;  %v578_v15 = vld [vmem:[#allocation8] sm:$0xff] }
  0x46   : > { %526 = vmatpush.msra.mxu2 %v499_v33  ;;  %560 = vmatpush.msra.mxu3 %v543_v50 }
  0x47   : > { %461 = vmatpush.msra.mxu0 %v432_v16  ;;  %v842_v16 = vld [vmem:[%s1259_s7] ss:$0 sm:$0xff] }
  0x48   : > { %527 = vmatpush.msra.mxu2 %v498_v34  ;;  %561 = vmatpush.msra.mxu3 %v542_v51 }
  0x49   : > { %462 = vmatpush.msra.mxu0 %v431_v17 }
  0x4a   : > { %528 = vmatpush.msra.mxu2 %v497_v35  ;;  %562 = vmatpush.msra.mxu3 %v541_v52 }
  0x4c   : > { %529 = vmatpush.msra.mxu2 %v496_v40  ;;  %563 = vmatpush.msra.mxu3 %v540_v55 }
  0x4e   : > { %530 = vmatpush.msra.mxu2 %v495_v41  ;;  %564 = vmatpush.msra.mxu3 %v539_v56 }
  0x50   : > { %565 = vmatpush.msra.mxu3 %v538_v57 }
  0x52   : > { %566 = vmatpush.msra.mxu3 %v537_v58 }
  0x54   : > { %567 = vmatpush.msra.mxu3 %v536_v59 }
  0xa3   : > { %v427_v20 = vpop.permute.xlu0 %426 }
  0xa4   : > { %vm428_vm0 = vcmp.eq.s32.totalorder %v424_v19, %v427_v20  ;;  %v843_v20 = vld [vmem:[%s1261_s9] ss:$0 sm:$0xff] }
  0xa5   : > { %750 = vmatmul.msk.f32.vlgmr.msra.gmra.mxu0 %vm428_vm0, %v1049_v21 }
 0x122   : > { %v464_v37 = vpop.f32.mrf.mxu0 }
 0x123   : > { %v468_v38 = vadd.f32 %v467_v36, %v464_v37 }
 0x125   : > { %489 = vmatpush.msra.mxu1 %v468_v38 }
 0x126   : > { %751 = vmatmul.msk.f32.vlgmr.msra.gmra.mxu1 %vm470_vm1, %v469_v39 }
 0x127   : > { %598 = vmatpush.msrb.mxu1 %v593_v60 }
 0x129   : > { %599 = vmatpush.msrb.mxu1 %v592_v61 }
 0x12b   : > { %600 = vmatpush.msrb.mxu1 %v591_v62 }
 0x12d   : > { %601 = vmatpush.msrb.mxu1 %v590_v63 }
 0x12f   : > { %602 = vmatpush.msrb.mxu1 %v589_v0 }
 0x131   : > { %603 = vmatpush.msrb.mxu1 %v588_v1 }
 0x133   : > { %604 = vmatpush.msrb.mxu1 %v587_v2 }
 0x135   : > { %605 = vmatpush.msrb.mxu1 %v586_v3 }
 0x137   : > { %606 = vmatpush.msrb.mxu1 %v585_v4 }
 0x139   : > { %607 = vmatpush.msrb.mxu1 %v584_v5 }
 0x13b   : > { %608 = vmatpush.msrb.mxu1 %v583_v6 }
 0x13d   : > { %609 = vmatpush.msrb.mxu1 %v582_v8 }
 0x13f   : > { %610 = vmatpush.msrb.mxu1 %v581_v10 }
 0x141   : > { %611 = vmatpush.msrb.mxu1 %v580_v13 }
 0x143   : > { %612 = vmatpush.msrb.mxu1 %v579_v14 }
 0x145   : > { %613 = vmatpush.msrb.mxu1 %v578_v15 }
 0x1a3   : > { %v491_v53 = vpop.f32.mrf.mxu1 }
 0x1a4   : > { %v494_v54 = vadd.f32 %v491_v53, %v468_v38 }
 0x1a6   : > { %531 = vmatmul.f32.vlgmr.msra.gmra.mxu2 %v494_v54 }
 0x229   : > { %v532_v9 = vpop.f32.mrf.mxu2 }
 0x22a   : > { %v533_v11 = vadd.f32 %v841_v7, %v532_v9 }
 0x22c   : > { %844 = vtanh.f32 %v533_v11 }
 0x232   : > { %v845_v12 = vpop.eup %844 }
 0x233   : > { %568 = vmatmul.f32.vlgmr.msra.gmra.mxu3 %v845_v12 }
 0x2b6   : > { %v569_v17 = vpop.f32.mrf.mxu3 }
 0x2b7   : > { %v572_v18 = vadd.f32 %v569_v17, %v494_v54 }
 0x2b9   : > { %v577_v19 = vadd.f32 %v842_v16, %v572_v18 }
 0x2bb   : > { %614 = vmatmul.f32.vlgmr.msrb.gmra.mxu1 %v577_v19 }
 0x338   : > { %v615_v21 = vpop.f32.mrf.mxu1 }
 0x339   : > { %v616_v22 = vadd.f32 %v843_v20, %v615_v21 }
 0x33b   : > { %618 = vst [vmem:[%s417_s22] sm:$0xff] %v616_v22 }
 0x33c   : > { %993 = shalt.err (!%p990_p8)
}
 0x33d   : > { %772 = dma.vmem_to_hbm [thread:$0]  (%p1143_p5), %s633_s24, 128, %s635_s25, %s620_s11  }
 0x33e PF: > { %p799_p9 = scmp.ge.s32.totalorder %s1040_s16, 2  ;;  %s646_s28 = sand.u32 1, %s1028_s13  }
 0x33f   : > { %s647_s20 = scalar_lea.sflag [#allocation4], %s646_s28 }
 0x340   : > { %p788_p10 = pnand %p799_p9, %p1147_p6 }
 0x342   : > { %p789_p11 = pneg %p788_p10 }
 0x344   : > { %1023 = dma.done.wait (%p789_p11), %s647_s20, 128  }
 0x345   : > { %1025 = vsyncadd (%p789_p11), %s647_s20, 4294967168  ;;  %s1280_s16 = sld [smem:[#allocation16_spill]]  ;;  %s1283_s13 = smov %s1032_s14 }
 0x346   : > { %s1281_s1 = sld [smem:[#allocation15_spill]] }
 0x347   : > { %s1282_s15 = sld [smem:[#allocation17_spill]] }
 0x34b   : > { %p23_p12 = scmp.ge.s32.totalorder %s1280_s16, 4  }
 0x34c   : > { %s1284_s14 = smov %s1281_s1 }
 0x34d   :  { %25 = sbr.rel (!%p23_p12) target bundleno = 9 (0x9), region = 112 }
 0x352   :  { %653 = vsyncpa [#allocation3], 1 }
 0x353   :  { %655 = vsyncpa [#allocation3 + $0x1], 1 }
 0x354   :  { %656 = vsyncpa [#allocation6], 1 }
 0x355   :  { %657 = vsyncpa [#allocation9], 1 }
 0x356   :  { %658 = vsyncpa [#allocation4], 1 }
 0x357   :  { %660 = vsyncpa [#allocation4 + $0x1], 1 }

</bundles_post_ra>
